<compile_context>
chip_gen: v5e
topology: v5e:2x2
jax: 0.10.0
libtpu: 0.0.40
codegen_flags: <defaults>
</compile_context>

<pallas_src>
import functools

import jax
import jax.numpy as jnp
import numpy as np
from jax.experimental import pallas as pl
from jax.experimental.pallas import tpu as pltpu


def dwconv2d_kernel(x_ref, wdw_ref, wpw_ref, bias_ref, o_ref, *,
                    kh, kw, wp, dh, dw, p_out):
    """x_ref:   (1, Cin, Lpad)  channel-major, flattened padded spatial
       wdw_ref: (Cin, KH*KW)    depthwise weights (tap t = i*KW + j)
       wpw_ref: (Cout, Cin)     pointwise weights
       bias_ref:(Cout, 1)       effective bias = W_pw @ b_dw
       o_ref:   (1, Cout, p_out) full-resolution (stride-1) outputs, lane-dense
    """
    x = x_ref[0]                                   # (Cin, Lpad)
    wdw = wdw_ref[...].astype(jnp.float32)         # (Cin, KH*KW)
    wpw = wpw_ref[...].astype(jnp.float32)         # (Cout, Cin)
    bias = bias_ref[...].astype(jnp.float32)       # (Cout, 1)
    cin = x.shape[0]
    cout = wpw.shape[0]

    # ---- depthwise: KH*KW shifted lane-dense slices, channel-batched FMAs.
    # Per-tap weight is a (Cin, 1) column -> broadcast along lanes only
    # (no (out_h, out_w, Cin) broadcast per tap as in the previous version).
    acc = jnp.zeros((cin, p_out), jnp.float32)
    for i in range(kh):
        for j in range(kw):
            s = i * dh * wp + j * dw               # flat spatial shift of tap (i, j)
            t = i * kw + j
            win = x[:, s:s + p_out].astype(jnp.float32)
            acc = acc + win * wdw[:, t:t + 1]

    # ---- pointwise 1x1: channel contraction; result stays lane-dense.
    if cin <= 16:
        # Tiny K: Cin sublane-batched VPU FMAs beat a near-empty MXU pass.
        res = jnp.zeros((cout, p_out), jnp.float32)
        for c in range(cin):
            res = res + acc[c:c + 1, :] * wpw[:, c:c + 1]
    else:
        res = jnp.dot(wpw, acc, preferred_element_type=jnp.float32)

    o_ref[0] = (res + bias).astype(o_ref.dtype)


def dwconv2d(x_nchw, w_dw, b_dw, w_pw, *, stride, padding, dilation):
    """x_nchw: (B, Cin, H, W); w_dw: (Cin, 1, KH, KW); b_dw: (Cin,);
    w_pw: (Cout, Cin, 1, 1).  Returns (B, Cout, Ho, Wo) like PyTorch."""
    B, Cin, H, W = x_nchw.shape
    KH, KW = int(w_dw.shape[2]), int(w_dw.shape[3])
    Cout = int(w_pw.shape[0])
    sh, sw = stride
    ph, pw_ = padding
    dh, dw_ = dilation

    Hp, Wp = H + 2 * ph, W + 2 * pw_
    # Full-resolution (stride-1) valid output extents on the padded input.
    oh_full = Hp - dh * (KH - 1)
    ow_full = Wp - dw_ * (KW - 1)
    # The kernel emits all rows [0, oh_full) x all cols [0, Wp) flattened on
    # lanes; cols >= ow_full are garbage (window wraps into padding/next row)
    # and are cropped in the wrapper.  A small right-tail of zeros keeps every
    # tap slice of length p_out in bounds.
    p_out = oh_full * Wp
    extra = dw_ * (KW - 1)
    Lpad = Hp * Wp + extra

    # Channel-major (already NCHW) -> zero pad spatially -> flatten spatial.
    x = jnp.pad(x_nchw, ((0, 0), (0, 0), (ph, ph), (pw_, pw_)))
    x = x.reshape(B, Cin, Hp * Wp)
    x = jnp.pad(x, ((0, 0), (0, 0), (0, extra)))

    wdw = w_dw[:, 0].reshape(Cin, KH * KW)               # (Cin, KH*KW)
    wpw = w_pw[:, :, 0, 0]                               # (Cout, Cin)
    # Fold the depthwise bias through the (bias-free) pointwise conv.
    bias_eff = (wpw.astype(jnp.float32)
                @ b_dw.astype(jnp.float32)).reshape(Cout, 1)

    kernel = functools.partial(
        dwconv2d_kernel, kh=KH, kw=KW, wp=Wp, dh=dh, dw=dw_, p_out=p_out)

    # TODO(synk): for large spatial sizes, add a row-tiled grid axis (with a
    # (KH-1)*dh halo) so the per-step block fits v7x's 64 MiB VMEM and the
    # pipeline gets >2 steps; at the test size the whole image is ~12 KB.
    out_flat = pl.pallas_call(
        kernel,
        out_shape=jax.ShapeDtypeStruct((B, Cout, p_out), x_nchw.dtype),
        grid_spec=pltpu.PrefetchScalarGridSpec(
            num_scalar_prefetch=0,
            grid=(B,),
            in_specs=[
                pl.BlockSpec((1, Cin, Lpad), lambda b: (b, 0, 0)),
                pl.BlockSpec((Cin, KH * KW), lambda b: (0, 0)),
                pl.BlockSpec((Cout, Cin), lambda b: (0, 0)),
                pl.BlockSpec((Cout, 1), lambda b: (0, 0)),
            ],
            out_specs=pl.BlockSpec((1, Cout, p_out), lambda b: (b, 0, 0)),
        ),
        compiler_params=pltpu.CompilerParams(
            dimension_semantics=("parallel",),
            vmem_limit_bytes=32 * 1024 * 1024),
    )(x, wdw, wpw, bias_eff)

    # Crop garbage columns, apply stride/dilation subsampling (wrapper glue),
    # result is already NCHW.
    out = out_flat.reshape(B, Cout, oh_full, Wp)
    out = out[:, :, ::sh, 0:ow_full:sw]
    return out


def _ref_forward(x, w_dw, b_dw, w_pw, stride, padding, dilation):
    """Pure-JAX reference mirroring nn.Conv2d(depthwise)+nn.Conv2d(1x1)."""
    y = jax.lax.conv_general_dilated(
        x, w_dw, window_strides=stride,
        padding=[(padding[0], padding[0]), (padding[1], padding[1])],
        rhs_dilation=dilation,
        dimension_numbers=('NCHW', 'OIHW', 'NCHW'),
        feature_group_count=x.shape[1])
    y = y + b_dw.reshape(1, -1, 1, 1)
    z = jax.lax.conv_general_dilated(
        y, w_pw, window_strides=(1, 1), padding='VALID',
        dimension_numbers=('NCHW', 'OIHW', 'NCHW'))
    return z


if __name__ == "__main__":
    # Module config: in_channels=4, out_channels=8, kernel_size=(3,3),
    # stride=(1,1), padding=(1,1), dilation=(1,1), groups=in_channels, bias=True
    B, Cin, H, W = 2, 4, 16, 16
    Cout, KH, KW = 8, 3, 3
    stride, padding, dilation = (1, 1), (1, 1), (1, 1)

    key = jax.random.PRNGKey(0)
    kx, kdw, kbdw, kpw = jax.random.split(key, 4)
    x = jax.random.normal(kx, (B, Cin, H, W), jnp.float32)
    w_dw = jax.random.normal(kdw, (Cin, 1, KH, KW), jnp.float32) * 0.1
    b_dw = jax.random.normal(kbdw, (Cin,), jnp.float32) * 0.1
    w_pw = jax.random.normal(kpw, (Cout, Cin, 1, 1), jnp.float32) * 0.1

    out = dwconv2d(x, w_dw, b_dw, w_pw,
                   stride=stride, padding=padding, dilation=dilation)
    out = jax.block_until_ready(out)

    ref = _ref_forward(x, w_dw, b_dw, w_pw, stride, padding, dilation)
    np.testing.assert_allclose(np.asarray(out), np.asarray(ref),
                               rtol=1e-4, atol=1e-4)
    print("KERNEL_OK")
</pallas_src>

<mosaic_0001>
module attributes {stable_mosaic.version = 11 : i64} {
  func.func @dwconv2d_kernel(%arg0: i32, %arg1: memref<1x4x326xf32, #tpu.memory_space<vmem>>, %arg2: memref<4x9xf32, #tpu.memory_space<vmem>>, %arg3: memref<8x4xf32, #tpu.memory_space<vmem>>, %arg4: memref<8x1xf32, #tpu.memory_space<vmem>>, %arg5: memref<1x8x288xf32, #tpu.memory_space<vmem>>) attributes {dimension_semantics = [#tpu.dimension_semantics<parallel>], iteration_bounds = array<i64: 2>, scalar_prefetch = 0 : i64, scratch_operands = 0 : i64, tpu.core_type = #tpu.core_type<tc>, window_params = [{transform_indices = @transform_0, window_bounds = array<i64: 1, 4, 326>}, {pipeline_mode = #tpu.pipeline_mode<synchronous>, transform_indices = @transform_1, window_bounds = array<i64: 4, 9>}, {pipeline_mode = #tpu.pipeline_mode<synchronous>, transform_indices = @transform_2, window_bounds = array<i64: 8, 4>}, {pipeline_mode = #tpu.pipeline_mode<synchronous>, transform_indices = @transform_3, window_bounds = array<i64: 8, 1>}, {transform_indices = @transform_4, window_bounds = array<i64: 1, 8, 288>}]} {
    %c0 = arith.constant 0 : index
    %c0_0 = arith.constant 0 : index
    %c0_1 = arith.constant 0 : index
    %0 = vector.load %arg1[%c0, %c0_0, %c0_1] : memref<1x4x326xf32, #tpu.memory_space<vmem>>, vector<1x4x326xf32>
    %1 = vector.shape_cast %0 : vector<1x4x326xf32> to vector<4x326xf32>
    %c0_2 = arith.constant 0 : index
    %c0_3 = arith.constant 0 : index
    %2 = vector.load %arg2[%c0_2, %c0_3] : memref<4x9xf32, #tpu.memory_space<vmem>>, vector<4x9xf32>
    %c0_4 = arith.constant 0 : index
    %c0_5 = arith.constant 0 : index
    %3 = vector.load %arg3[%c0_4, %c0_5] : memref<8x4xf32, #tpu.memory_space<vmem>>, vector<8x4xf32>
    %c0_6 = arith.constant 0 : index
    %c0_7 = arith.constant 0 : index
    %4 = vector.load %arg4[%c0_6, %c0_7] : memref<8x1xf32, #tpu.memory_space<vmem>>, vector<8x1xf32>
    %cst = arith.constant 0.000000e+00 : f32
    %5 = vector.broadcast %cst : f32 to vector<4x288xf32>
    %6 = vector.extract_strided_slice %1 {offsets = [0, 0], sizes = [4, 288], strides = [1, 1]} : vector<4x326xf32> to vector<4x288xf32>
    %7 = vector.extract_strided_slice %2 {offsets = [0, 0], sizes = [4, 1], strides = [1, 1]} : vector<4x9xf32> to vector<4x1xf32>
    %8 = vector.broadcast %7 : vector<4x1xf32> to vector<4x288xf32>
    %9 = arith.mulf %6, %8 : vector<4x288xf32>
    %10 = arith.addf %5, %9 : vector<4x288xf32>
    %11 = vector.extract_strided_slice %1 {offsets = [0, 1], sizes = [4, 288], strides = [1, 1]} : vector<4x326xf32> to vector<4x288xf32>
    %12 = vector.extract_strided_slice %2 {offsets = [0, 1], sizes = [4, 1], strides = [1, 1]} : vector<4x9xf32> to vector<4x1xf32>
    %13 = vector.broadcast %12 : vector<4x1xf32> to vector<4x288xf32>
    %14 = arith.mulf %11, %13 : vector<4x288xf32>
    %15 = arith.addf %10, %14 : vector<4x288xf32>
    %16 = vector.extract_strided_slice %1 {offsets = [0, 2], sizes = [4, 288], strides = [1, 1]} : vector<4x326xf32> to vector<4x288xf32>
    %17 = vector.extract_strided_slice %2 {offsets = [0, 2], sizes = [4, 1], strides = [1, 1]} : vector<4x9xf32> to vector<4x1xf32>
    %18 = vector.broadcast %17 : vector<4x1xf32> to vector<4x288xf32>
    %19 = arith.mulf %16, %18 : vector<4x288xf32>
    %20 = arith.addf %15, %19 : vector<4x288xf32>
    %21 = vector.extract_strided_slice %1 {offsets = [0, 18], sizes = [4, 288], strides = [1, 1]} : vector<4x326xf32> to vector<4x288xf32>
    %22 = vector.extract_strided_slice %2 {offsets = [0, 3], sizes = [4, 1], strides = [1, 1]} : vector<4x9xf32> to vector<4x1xf32>
    %23 = vector.broadcast %22 : vector<4x1xf32> to vector<4x288xf32>
    %24 = arith.mulf %21, %23 : vector<4x288xf32>
    %25 = arith.addf %20, %24 : vector<4x288xf32>
    %26 = vector.extract_strided_slice %1 {offsets = [0, 19], sizes = [4, 288], strides = [1, 1]} : vector<4x326xf32> to vector<4x288xf32>
    %27 = vector.extract_strided_slice %2 {offsets = [0, 4], sizes = [4, 1], strides = [1, 1]} : vector<4x9xf32> to vector<4x1xf32>
    %28 = vector.broadcast %27 : vector<4x1xf32> to vector<4x288xf32>
    %29 = arith.mulf %26, %28 : vector<4x288xf32>
    %30 = arith.addf %25, %29 : vector<4x288xf32>
    %31 = vector.extract_strided_slice %1 {offsets = [0, 20], sizes = [4, 288], strides = [1, 1]} : vector<4x326xf32> to vector<4x288xf32>
    %32 = vector.extract_strided_slice %2 {offsets = [0, 5], sizes = [4, 1], strides = [1, 1]} : vector<4x9xf32> to vector<4x1xf32>
    %33 = vector.broadcast %32 : vector<4x1xf32> to vector<4x288xf32>
    %34 = arith.mulf %31, %33 : vector<4x288xf32>
    %35 = arith.addf %30, %34 : vector<4x288xf32>
    %36 = vector.extract_strided_slice %1 {offsets = [0, 36], sizes = [4, 288], strides = [1, 1]} : vector<4x326xf32> to vector<4x288xf32>
    %37 = vector.extract_strided_slice %2 {offsets = [0, 6], sizes = [4, 1], strides = [1, 1]} : vector<4x9xf32> to vector<4x1xf32>
    %38 = vector.broadcast %37 : vector<4x1xf32> to vector<4x288xf32>
    %39 = arith.mulf %36, %38 : vector<4x288xf32>
    %40 = arith.addf %35, %39 : vector<4x288xf32>
    %41 = vector.extract_strided_slice %1 {offsets = [0, 37], sizes = [4, 288], strides = [1, 1]} : vector<4x326xf32> to vector<4x288xf32>
    %42 = vector.extract_strided_slice %2 {offsets = [0, 7], sizes = [4, 1], strides = [1, 1]} : vector<4x9xf32> to vector<4x1xf32>
    %43 = vector.broadcast %42 : vector<4x1xf32> to vector<4x288xf32>
    %44 = arith.mulf %41, %43 : vector<4x288xf32>
    %45 = arith.addf %40, %44 : vector<4x288xf32>
    %46 = vector.extract_strided_slice %1 {offsets = [0, 38], sizes = [4, 288], strides = [1, 1]} : vector<4x326xf32> to vector<4x288xf32>
    %47 = vector.extract_strided_slice %2 {offsets = [0, 8], sizes = [4, 1], strides = [1, 1]} : vector<4x9xf32> to vector<4x1xf32>
    %48 = vector.broadcast %47 : vector<4x1xf32> to vector<4x288xf32>
    %49 = arith.mulf %46, %48 : vector<4x288xf32>
    %50 = arith.addf %45, %49 : vector<4x288xf32>
    %cst_8 = arith.constant 0.000000e+00 : f32
    %51 = vector.broadcast %cst_8 : f32 to vector<8x288xf32>
    %52 = vector.extract_strided_slice %50 {offsets = [0, 0], sizes = [1, 288], strides = [1, 1]} : vector<4x288xf32> to vector<1x288xf32>
    %53 = vector.extract_strided_slice %3 {offsets = [0, 0], sizes = [8, 1], strides = [1, 1]} : vector<8x4xf32> to vector<8x1xf32>
    %54 = vector.broadcast %52 : vector<1x288xf32> to vector<8x288xf32>
    %55 = vector.broadcast %53 : vector<8x1xf32> to vector<8x288xf32>
    %56 = arith.mulf %54, %55 : vector<8x288xf32>
    %57 = arith.addf %51, %56 : vector<8x288xf32>
    %58 = vector.extract_strided_slice %50 {offsets = [1, 0], sizes = [1, 288], strides = [1, 1]} : vector<4x288xf32> to vector<1x288xf32>
    %59 = vector.extract_strided_slice %3 {offsets = [0, 1], sizes = [8, 1], strides = [1, 1]} : vector<8x4xf32> to vector<8x1xf32>
    %60 = vector.broadcast %58 : vector<1x288xf32> to vector<8x288xf32>
    %61 = vector.broadcast %59 : vector<8x1xf32> to vector<8x288xf32>
    %62 = arith.mulf %60, %61 : vector<8x288xf32>
    %63 = arith.addf %57, %62 : vector<8x288xf32>
    %64 = vector.extract_strided_slice %50 {offsets = [2, 0], sizes = [1, 288], strides = [1, 1]} : vector<4x288xf32> to vector<1x288xf32>
    %65 = vector.extract_strided_slice %3 {offsets = [0, 2], sizes = [8, 1], strides = [1, 1]} : vector<8x4xf32> to vector<8x1xf32>
    %66 = vector.broadcast %64 : vector<1x288xf32> to vector<8x288xf32>
    %67 = vector.broadcast %65 : vector<8x1xf32> to vector<8x288xf32>
    %68 = arith.mulf %66, %67 : vector<8x288xf32>
    %69 = arith.addf %63, %68 : vector<8x288xf32>
    %70 = vector.extract_strided_slice %50 {offsets = [3, 0], sizes = [1, 288], strides = [1, 1]} : vector<4x288xf32> to vector<1x288xf32>
    %71 = vector.extract_strided_slice %3 {offsets = [0, 3], sizes = [8, 1], strides = [1, 1]} : vector<8x4xf32> to vector<8x1xf32>
    %72 = vector.broadcast %70 : vector<1x288xf32> to vector<8x288xf32>
    %73 = vector.broadcast %71 : vector<8x1xf32> to vector<8x288xf32>
    %74 = arith.mulf %72, %73 : vector<8x288xf32>
    %75 = arith.addf %69, %74 : vector<8x288xf32>
    %76 = vector.broadcast %4 : vector<8x1xf32> to vector<8x288xf32>
    %77 = arith.addf %75, %76 : vector<8x288xf32>
    %c0_9 = arith.constant 0 : index
    %c0_10 = arith.constant 0 : index
    %c0_11 = arith.constant 0 : index
    %78 = vector.load %arg5[%c0_9, %c0_10, %c0_11] : memref<1x8x288xf32, #tpu.memory_space<vmem>>, vector<1x8x288xf32>
    %79 = vector.shape_cast %78 : vector<1x8x288xf32> to vector<8x288xf32>
    %80 = vector.shape_cast %77 : vector<8x288xf32> to vector<1x8x288xf32>
    tpu.vector_store %arg5[%c0_9, %c0_10, %c0_11], %80 {strides = array<i32>} : memref<1x8x288xf32, #tpu.memory_space<vmem>>, vector<1x8x288xf32>,
    return
  }
  func.func @transform_0(%arg0: i32) -> (i32, i32, i32) {
    %c0_i32 = arith.constant 0 : i32
    %c0_i32_0 = arith.constant 0 : i32
    %c0_i32_1 = arith.constant 0 : i32
    return %arg0, %c0_i32, %c0_i32_0 : i32, i32, i32
  }
  func.func @transform_1(%arg0: i32) -> (i32, i32) {
    %c0_i32 = arith.constant 0 : i32
    %c0_i32_0 = arith.constant 0 : i32
    %c0_i32_1 = arith.constant 0 : i32
    return %c0_i32, %c0_i32_0 : i32, i32
  }
  func.func @transform_2(%arg0: i32) -> (i32, i32) {
    %c0_i32 = arith.constant 0 : i32
    %c0_i32_0 = arith.constant 0 : i32
    %c0_i32_1 = arith.constant 0 : i32
    return %c0_i32, %c0_i32_0 : i32, i32
  }
  func.func @transform_3(%arg0: i32) -> (i32, i32) {
    %c0_i32 = arith.constant 0 : i32
    %c0_i32_0 = arith.constant 0 : i32
    %c0_i32_1 = arith.constant 0 : i32
    return %c0_i32, %c0_i32_0 : i32, i32
  }
  func.func @transform_4(%arg0: i32) -> (i32, i32, i32) {
    %c0_i32 = arith.constant 0 : i32
    %c0_i32_0 = arith.constant 0 : i32
    %c0_i32_1 = arith.constant 0 : i32
    return %arg0, %c0_i32, %c0_i32_0 : i32, i32, i32
  }
}

</mosaic_0001>

<bundles_post_ra>
// kernel: tpu_custom_call.1
= control target key start
LH: loop header
LB: loop body
LE: loop exit
PB: predicated region body
PF: predicated region fallthrough
CT: control target
= control target key end

     0   :  { %9 = vsyncpa [#allocation3], 0  ;;  %s1024_s0 = inlined_call_operand.hbm [shape: f32[2,4,326], index: 0, kind: input, shape index: {}]   ;;  %s1025_s1 = inlined_call_operand.vmem [shape: f32[4,9], index: 1, kind: input, shape index: {}]   ;;  %s1026_s2 = inlined_call_operand.vmem [shape: f32[8,4], index: 2, kind: input, shape index: {}]   ;;  %s1027_s3 = inlined_call_operand.vmem [shape: f32[8,1], index: 3, kind: input, shape index: {}]   ;;  %s1028_s4 = inlined_call_operand.hbm [shape: f32[2,8,288], index: 4, kind: output, shape index: {}]  }
   0x1   :  { %11 = vsyncpa [#allocation3 + $0x1], 0 }
   0x2   :  { %12 = vsyncpa [#allocation4], 0 }
   0x3   :  { %14 = vsyncpa [#allocation4 + $0x1], 0  ;;  %s844_s15 = smov 0   ;;  %s846_s16 = smov 0  }
   0x4   :  { %s848_s17 = smov 0   ;;  %s850_s18 = smov 0  }
   0x5 LB: > { %s865_s19 = sadd.s32 4294967295, %s799_s18   ;;  %s613_s20 = sadd.s32 4294967294, %s799_s18   ;;  %s799_s18 = sphi %s850_s18, %s1036_s18   ;;  %s795_s17 = sphi %s848_s17, %s1035_s17   ;;  %s791_s16 = sphi %s846_s16, %s1034_s16   ;;  %s787_s15 = sphi %s844_s15, %s1033_s15  }
   0x6   : > { %s869_s21 = sadd.s32 1, %s799_s18   ;;  %s27_s22 = sadd.s32 1, %s795_s17 }
   0x7   : > { %s24_s23 = ssub.s32 %s799_s18, %s869_s21  ;;  %p34_p0 = scmp.ne.s32.totalorder %s795_s17, %s791_s16 }
   0x8   : > { %p25_p1 = scmp.eq.s32.totalorder %s24_s23, 0  ;;  %p35_p2 = scmp.eq.s32.totalorder %s799_s18, 0 }
   0x9   : > { %p40_p3 = scmp.ne.s32.totalorder %s791_s16, %s787_s15  ;;  %p41_p4 = scmp.eq.s32.totalorder %s865_s19, 0 }
   0xa   : > { %s881_s24 = scalar_select %p25_p1, %s795_s17, %s27_s22  }
   0xb   : > { %p36_p5 = por %p35_p2, %p34_p0  ;;  %p883_p6 = por %p41_p4, %p40_p3 }
   0xc   : > { %p127_p7 = scmp.eq.s32.totalorder %s865_s19, 1  ;;  %p133_p8 = scmp.eq.s32.totalorder %s613_s20, 1 }
   0xd   : > { %p615_p9 = scmp.ge.s32.totalorder %s799_s18, 2  ;;  %p638_p10 = scmp.lt.s32.totalorder %s799_s18, 2 }
   0xe   : > { %p890_p11 = por %p127_p7, %p34_p0  ;;  %p894_p12 = por %p133_p8, %p40_p3 }
   0xf   : > { %s162_s28 = sand.u32 1, %s795_s17   ;;  %s622_s29 = smul.u32 12, %s799_s18 }
  0x10   : > { %s621_s30 = smul.u32 12, %s162_s28  ;;  %p903_p13 = pnand %p638_p10, %p36_p5 }
  0x11   : > { %s171_s7 = scalar_lea.hbm %s1024_s0, %s622_s29  ;;  %s163_s12 = scalar_lea.sflag [#allocation3], %s162_s28 }
  0x12   : > { %s173_s9 = sshll.u32 %s171_s7, 4  ;;  %s166_s10 = scalar_lea.vmem [#allocation2], %s621_s30  ;;  %s174_s9 = int_to_ptr.hbm [resolvable:$true] %s173_s9 }
  0x13   : > { %s175_s11 = sshll.u32 %s166_s10, 4  ;;  %s703_s13 = sshra.s32 %s174_s9, 4  ;;  %s176_s11 = int_to_ptr.vmem [resolvable:$true] %s175_s11  ;;  %s704_s13 = int_to_ptr.hbm [resolvable:$true] %s703_s13 }
  0x14   : > { %s705_s14 = scalar_lea.hbm %s704_s13, 12  ;;  %p707_p1 = pneg %p903_p13 }
  0x15   : > { %p706_p0 = scmp.ne.s32.totalorder %s704_s13, %s705_s14  ;;  %s710_s23 = scalar_lea.hbm %s1024_s0, 24 }
  0x16   : > { %p711_p4 = scmp.lt.s32.totalorder %s704_s13, %s1024_s0  ;;  %p712_p5 = scmp.lt.s32.totalorder %s710_s23, %s705_s14 }
  0x17   : > { %p708_p2 = pnand %p707_p1, %p706_p0 }
  0x18   : > { %p713_p7 = por %p712_p5, %p711_p4 }
  0x19   : > { %p709_p3 = pneg %p708_p2 }
  0x1b   : > { %p714_p8 = pnand %p713_p7, %p709_p3 }
  0x1d   : > { %717 = shalt.err (!%p714_p8)
}
  0x1e   : > { %633 = dma.hbm_to_vmem [thread:$0]  (!%p903_p13), %s174_s9, 192, %s176_s11, %s163_s12  }
  0x1f   : > { %p617_p10 = scmp.ge.s32.totalorder %s799_s18, 1  ;;  %p180_p0 = scmp.lt.s32.totalorder %s799_s18, 3 }
  0x21   : > { %p181_p1 = pnand %p617_p10, %p180_p0 }
  0x22   : > { %s920_s28 = sand.u32 (!%p181_p1), 1, %s791_s16  }
  0x23   : > { %184 = sbr.rel (%p181_p1) target bundleno = 353 (0x161), region = 36  ;;  %s187_s6 = scalar_lea.sflag (!%p181_p1), [#allocation3], %s920_s28 }
  0x24   : > { %s623_s30 = smul.u32 (!%p181_p1), 12, %s920_s28 }
  0x26   : > { %s924_s7 = scalar_lea.vmem (!%p181_p1), [#allocation2], %s623_s30 }
  0x28   : > { %778 = dma.done.wait (%p883_p6), %s187_s6, 192  }
  0x29   : > { %780 = vsyncadd (%p883_p6), %s187_s6, 4294967104  ;;  %v801_v0 = vmov 1   ;;  %v802_v1 = vmov 4   ;;  %v803_v2 = vmov 2   ;;  %v218_v3 = vld [vmem:[%s1025_s1] sm:$0xf] }
  0x2a   : > { %690 = vset.pattern.permute.xlu0 %v801_v0  ;;  %693 = vset.pattern.permute.xlu1 %v802_v1  ;;  %v804_v4 = vmov 6   ;;  %v805_v5 = vmov 7   ;;  %v806_v6 = vmov 3   ;;  %v807_v7 = vmov 5   ;;  %v939_v15 = vld [vmem:[%s924_s7 + $0x8] sm:$0xf] }
  0x2b   : > { %691 = vset.pattern.permute.xlu2 %v803_v2  ;;  %235 = vperm.xlu0 %690, %v218_v3   ;;  %v808_v8 = vmov 8   ;;  %v809_v9 = vmov 0   ;;  %v810_v10 = vmov 839922192   ;;  %s811_s25 = smov 126   ;;  %v944_v17 = vld [vmem:[%s924_s7] sm:$0xff] }
  0x2c   : > { %311 = vperm.xlu1 %693, %v218_v3   ;;  %261 = vperm.xlu2 %691, %v218_v3   ;;  %v226_v11 = vunpack.c.l.s4 %v810_v10  ;;  %s812_s10 = smov 110   ;;  %s813_s11 = smov 127   ;;  %v219_v44 = vld [vmem:[%s1026_s2] sm:$0xff]  ;;  %vm252_vm0 = vcmask 1043456   ;;  %vm254_vm1 = vcmask 1039360   ;;  %vm279_vm2 = vcmask 1031168  }
  0x2d   : > { %s814_s12 = smov 109   ;;  %s815_s13 = smov 92   ;;  %v220_v47 = vld [vmem:[%s1027_s3] sm:$0xff]  ;;  %vm304_vm3 = vcmask 900096   ;;  %vm329_vm4 = vcmask 891904   ;;  %vm354_vm5 = vcmask 883712  }
  0x2e   : > { %v935_v12 = vunpack.c.0.s8 %v226_v11  ;;  %s816_s14 = smov 108   ;;  %s817_s20 = smov 91   ;;  %vm379_vm6 = vcmask 752640   ;;  %vm404_vm7 = vcmask 744448   ;;  %vm429_vm8 = vcmask 736256  }
  0x2f   : > { %s818_s29 = smov 90   ;;  %s624_s6 = smul.u32 24, %s920_s28  ;;  %vm524_vm9 = vcmask 261120  }
  0x30   : > { %s625_s7 = smul.u32 24, %s865_s19  ;;  %s753_s23 = scalar_lea.hbm %s1028_s4, 48 }
  0x31   : > { %s215_s19 = scalar_lea.vmem [#allocation5], %s624_s6 }
  0x33   : > { %695 = vset.pattern.permute.xlu0 %v804_v4 }
  0x34   : > { %697 = vset.pattern.permute.xlu1 %v805_v5  ;;  %361 = vperm.xlu0 %695, %v218_v3  }
  0x35   : > { %692 = vset.pattern.permute.xlu2 %v806_v6  ;;  %386 = vperm.xlu1 %697, %v218_v3  }
  0x36   : > { %286 = vperm.xlu2 %692, %v218_v3  }
  0x3c   : > { %696 = vset.pattern.permute.xlu0 %v809_v9 }
  0x3d   : > { %699 = vset.pattern.permute.xlu1 %v801_v0  ;;  %223 = vperm.xlu0 %696, %v218_v3  }
  0x3e   : > { %694 = vset.pattern.permute.xlu2 %v807_v7 }
  0x3f   : > { %336 = vperm.xlu2 %694, %v218_v3  }
  0x47   : > { %698 = vset.pattern.permute.xlu2 %v808_v8 }
  0x48   : > { %411 = vperm.xlu2 %698, %v218_v3  }
  0x50   : > { %700 = vset.pattern.permute.xlu2 %v803_v2 }
  0x86   : > { %v262_v13 = vpop.permute.xlu2 %261 }
  0x87   : > { %v266_v14 = vperm.slane %v262_v13, %v935_v12 }
  0x89   : > { %v269_v16 = vmul.f32 %v266_v14, %v939_v15  ;;  %v268_v39 = vmul.f32 %v266_v14, %v944_v17 }
  0x8b   : > { %274 = vrot.lane.b32.xlu2 %v269_v16, %s811_s25 }
  0x90   : > { %v287_v18 = vpop.permute.xlu2 %286 }
  0x91   : > { %v291_v19 = vperm.slane %v287_v18, %v935_v12 }
  0x93   : > { %v293_v20 = vmul.f32 %v291_v19, %v944_v17  ;;  %v294_v42 = vmul.f32 %v291_v19, %v939_v15 }
  0x95   : > { %297 = vrot.lane.b32.xlu0 %v293_v20, %s812_s10 }
  0x99   : > { %v337_v28 = vpop.permute.xlu2 %336 }
  0x9a   : > { %v341_v29 = vperm.slane %v337_v28, %v935_v12 }
  0x9c   : > { %v344_v32 = vmul.f32 %v341_v29, %v939_v15  ;;  %v343_v45 = vmul.f32 %v341_v29, %v944_v17 }
  0x9d   : > { %v236_v21 = vpop.permute.xlu0 %235 }
  0x9e   : > { %v312_v22 = vpop.permute.xlu1 %311  ;;  %v240_v23 = vperm.slane %v236_v21, %v935_v12 }
  0x9f   : > { %v316_v24 = vperm.slane %v312_v22, %v935_v12 }
  0xa0   : > { %v242_v25 = vmul.f32 %v240_v23, %v944_v17  ;;  %v243_v33 = vmul.f32 %v240_v23, %v939_v15 }
  0xa1   : > { %v318_v26 = vmul.f32 %v316_v24, %v944_v17  ;;  %v319_v27 = vmul.f32 %v316_v24, %v939_v15 }
  0xa2   : > { %246 = vrot.lane.b32.xlu1 %v242_v25, %s813_s11  ;;  %v412_v40 = vpop.permute.xlu2 %411 }
  0xa3   : > { %324 = vrot.lane.b32.xlu0 %v319_v27, %s814_s12  ;;  %322 = vrot.lane.b32.xlu2 %v318_v26, %s814_s12  ;;  %v416_v41 = vperm.slane %v412_v40, %v935_v12  ;;  %s527_s12 = scalar_lea.sflag [#allocation4], %s920_s28 }
  0xa5   : > { %v419_v43 = vmul.f32 %v416_v41, %v939_v15  ;;  %v418_v48 = vmul.f32 %v416_v41, %v944_v17 }
  0xa6   : > { %v362_v30 = vpop.permute.xlu0 %361 }
  0xa7   : > { %v366_v31 = vperm.slane %v362_v30, %v935_v12  ;;  %v387_v34 = vpop.permute.xlu1 %386 }
  0xa8   : > { %v391_v36 = vperm.slane %v387_v34, %v935_v12 }
  0xa9   : > { %v368_v35 = vmul.f32 %v366_v31, %v944_v17  ;;  %v369_v46 = vmul.f32 %v366_v31, %v939_v15 }
  0xaa   : > { %248 = vrot.lane.b32.xlu1 %v243_v33, %s813_s11  ;;  %v393_v37 = vmul.f32 %v391_v36, %v944_v17  ;;  %v394_v38 = vmul.f32 %v391_v36, %v939_v15 }
  0xab   : > { %372 = vrot.lane.b32.xlu0 %v368_v35, %s815_s13  ;;  %349 = vrot.lane.b32.xlu2 %v344_v32, %s816_s14 }
  0xaf   : > { %v224_v50 = vpop.permute.xlu0 %223 }
  0xb0   : > { %v228_v56 = vperm.slane %v224_v50, %v935_v12 }
  0xb2   : > { %272 = vrot.lane.b32.xlu1 %v268_v39, %s811_s25  ;;  %v231_v57 = vmul.f32 %v228_v56, %v939_v15  ;;  %s538_s25 = scalar_lea.hbm %s1028_s4, %s625_s7 }
  0xb3   : > { %399 = vrot.lane.b32.xlu0 %v394_v38, %s817_s20  ;;  %397 = vrot.lane.b32.xlu2 %v393_v37, %s817_s20  ;;  %s542_s11 = sshll.u32 %s538_s25, 4  ;;  %s543_s11 = int_to_ptr.hbm [resolvable:$true] %s542_s11 }
  0xba   : > { %299 = vrot.lane.b32.xlu1 %v294_v42, %s812_s10  ;;  %s540_s10 = sshll.u32 %s215_s19, 4  ;;  %s541_s10 = int_to_ptr.vmem [resolvable:$true] %s540_s10 }
  0xbb   : > { %448 = vperm.xlu0 %696, %v219_v44   ;;  %424 = vrot.lane.b32.xlu2 %v419_v43, %s818_s29 }
  0xc2   : > { %347 = vrot.lane.b32.xlu1 %v343_v45, %s816_s14 }
  0xc3   : > { %486 = vperm.xlu2 %700, %v219_v44  }
  0xca   : > { %374 = vrot.lane.b32.xlu1 %v369_v46, %s815_s13  ;;  %s747_s13 = sshra.s32 %s543_s11, 4  ;;  %s748_s13 = int_to_ptr.hbm [resolvable:$true] %s747_s13 }
  0xcb   : > { %702 = vset.pattern.permute.xlu2 %v809_v9  ;;  %s749_s14 = scalar_lea.hbm %s748_s13, 24  ;;  %p754_p3 = scmp.lt.s32.totalorder %s748_s13, %s1028_s4 }
  0xcc   : > { %516 = vperm.xlu2 %702, %v220_v47   ;;  %p750_p6 = scmp.ne.s32.totalorder %s748_s13, %s749_s14  ;;  %p755_p4 = scmp.lt.s32.totalorder %s753_s23, %s749_s14 }
  0xce   : > { %p751_p13 = pnand %p750_p6, %p890_p11  ;;  %p756_p5 = por %p755_p4, %p754_p3 }
  0xd0   : > { %p752_p2 = pneg %p751_p13 }
  0xd2   : > { %422 = vrot.lane.b32.xlu1 %v418_v48, %s818_s29  ;;  %p757_p7 = pnand %p756_p5, %p752_p2 }
  0xda   : > { %467 = vperm.xlu1 %699, %v219_v44  }
  0xe2   : > { %701 = vset.pattern.permute.xlu1 %v806_v6  ;;  %v230_v6 = vmul.f32 %v228_v56, %v944_v17 }
  0xe3   : > { %505 = vperm.xlu1 %701, %v219_v44  }
  0xe5   : > { %v275_v51 = vpop.permute.xlu2 %274 }
  0xe6   : > { %v277_v1 = vrot.slane %v275_v51, 4 }
  0xfd   : > { %v323_v54 = vpop.permute.xlu2 %322 }
  0xfe   : > { %v326_v13 = vrot.slane %v323_v54, 4 }
 0x105   : > { %v350_v60 = vpop.permute.xlu2 %349 }
 0x106   : > { %v352_v22 = vrot.slane %v350_v60, 4 }
 0x107   : > { %v298_v53 = vpop.permute.xlu0 %297 }
 0x108   : > { %v301_v2 = vrot.slane %v298_v53, 4 }
 0x10d   : > { %v398_v16 = vpop.permute.xlu2 %397 }
 0x10e   : > { %v401_v31 = vrot.slane %v398_v16, 4 }
 0x114   : > { %v247_v49 = vpop.permute.xlu1 %246 }
 0x115   : > { %v325_v58 = vpop.permute.xlu0 %324  ;;  %v250_v63 = vrot.slane %v247_v49, 4  ;;  %v425_v40 = vpop.permute.xlu2 %424 }
 0x116   : > { %v327_v14 = vrot.slane %v325_v58, 4  ;;  %v427_v46 = vrot.slane %v425_v40, 4 }
 0x118   : > { %v328_v23 = vsel %vm252_vm0, %v326_v13, %v327_v14 }
 0x119   : > { %v330_v33 = vsel %vm329_vm4, %v323_v54, %v328_v23 }
 0x11c   : > { %v249_v52 = vpop.permute.xlu1 %248 }
 0x11d   : > { %v251_v61 = vrot.slane %v249_v52, 4  ;;  %v259_v62 = vadd.f32 %v249_v52, %v231_v57  ;;  %v373_v9 = vpop.permute.xlu0 %372 }
 0x11e   : > { %v376_v24 = vrot.slane %v373_v9, 4 }
 0x11f   : > { %v253_v3 = vsel %vm252_vm0, %v250_v63, %v251_v61  ;;  %v284_v4 = vadd.f32 %v275_v51, %v259_v62 }
 0x120   : > { %v255_v10 = vsel %vm254_vm1, %v247_v49, %v253_v3 }
 0x121   : > { %v258_v18 = vadd.f32 %v255_v10, %v230_v6  ;;  %v487_v10 = vpop.permute.xlu2 %486 }
 0x124   : > { %v273_v55 = vpop.permute.xlu1 %272 }
 0x125   : > { %v276_v0 = vrot.slane %v273_v55, 4  ;;  %v400_v32 = vpop.permute.xlu0 %399 }
 0x126   : > { %v402_v35 = vrot.slane %v400_v32, 4 }
 0x127   : > { %v278_v7 = vsel %vm252_vm0, %v276_v0, %v277_v1 }
 0x128   : > { %v280_v15 = vsel %vm279_vm2, %v273_v55, %v278_v7  ;;  %v403_v43 = vsel %vm252_vm0, %v401_v31, %v402_v35 }
 0x129   : > { %v283_v17 = vadd.f32 %v280_v15, %v258_v18  ;;  %v405_v48 = vsel %vm404_vm7, %v398_v16, %v403_v43  ;;  %v517_v35 = vpop.permute.xlu2 %516 }
 0x12c   : > { %v300_v59 = vpop.permute.xlu1 %299 }
 0x12d   : > { %v302_v5 = vrot.slane %v300_v59, 4  ;;  %v309_v8 = vadd.f32 %v300_v59, %v284_v4  ;;  %v449_v1 = vpop.permute.xlu0 %448 }
 0x12f   : > { %v303_v12 = vsel %vm252_vm0, %v301_v2, %v302_v5  ;;  %v334_v19 = vadd.f32 %v325_v58, %v309_v8 }
 0x130   : > { %v305_v21 = vsel %vm304_vm3, %v298_v53, %v303_v12 }
 0x131   : > { %v308_v25 = vadd.f32 %v305_v21, %v283_v17  ;;  %v359_v27 = vadd.f32 %v350_v60, %v334_v19 }
 0x133   : > { %v333_v36 = vadd.f32 %v330_v33, %v308_v25 }
 0x134   : > { %v348_v11 = vpop.permute.xlu1 %347 }
 0x135   : > { %v351_v20 = vrot.slane %v348_v11, 4 }
 0x137   : > { %v353_v26 = vsel %vm252_vm0, %v351_v20, %v352_v22 }
 0x138   : > { %v355_v34 = vsel %vm354_vm5, %v348_v11, %v353_v26 }
 0x139   : > { %v358_v41 = vadd.f32 %v355_v34, %v333_v36 }
 0x13c   : > { %v375_v28 = vpop.permute.xlu1 %374 }
 0x13d   : > { %v377_v29 = vrot.slane %v375_v28, 4  ;;  %v384_v30 = vadd.f32 %v375_v28, %v359_v27 }
 0x13f   : > { %v378_v37 = vsel %vm252_vm0, %v376_v24, %v377_v29  ;;  %v409_v38 = vadd.f32 %v400_v32, %v384_v30 }
 0x140   : > { %v380_v39 = vsel %vm379_vm6, %v373_v9, %v378_v37 }
 0x141   : > { %v434_v42 = vadd.f32 %v425_v40, %v409_v38  ;;  %v383_v44 = vadd.f32 %v380_v39, %v358_v41 }
 0x143   : > { %v439_v49 = vperm.slane %v434_v42, 0  ;;  %v408_v50 = vadd.f32 %v405_v48, %v383_v44  ;;  %v459_v53 = vperm.slane %v434_v42, 1  ;;  %v478_v55 = vperm.slane %v434_v42, 2 }
 0x144   : > { %v423_v45 = vpop.permute.xlu1 %422  ;;  %v497_v5 = vperm.slane %v434_v42, 3 }
 0x145   : > { %v426_v47 = vrot.slane %v423_v45, 4  ;;  %v445_v56 = vperm.slane %v439_v49, 0  ;;  %v465_v61 = vperm.slane %v459_v53, 1  ;;  %v484_v2 = vperm.slane %v478_v55, 2 }
 0x146   : > { %v503_v25 = vperm.slane %v497_v5, 3 }
 0x147   : > { %v428_v51 = vsel %vm252_vm0, %v426_v47, %v427_v46  ;;  %v453_v6 = vmul.f32 %v449_v1, %v445_v56  ;;  %v491_v23 = vmul.f32 %v487_v10, %v484_v2 }
 0x148   : > { %v430_v52 = vsel %vm429_vm8, %v423_v45, %v428_v51 }
 0x149   : > { %v433_v54 = vadd.f32 %v430_v52, %v408_v50 }
 0x14b   : > { %v476_v57 = vperm.slane %v433_v54, 2  ;;  %v437_v58 = vperm.slane %v433_v54, 0  ;;  %v438_v59 = vperm.slane %v433_v54, 4  ;;  %v477_v60 = vperm.slane %v433_v54, 6 }
 0x14c   : > { %v468_v62 = vpop.permute.xlu1 %467  ;;  %v457_v63 = vperm.slane %v433_v54, 1  ;;  %v458_v0 = vperm.slane %v433_v54, 5  ;;  %v495_v14 = vperm.slane %v433_v54, 3  ;;  %v496_v19 = vperm.slane %v433_v54, 7 }
 0x14d   : > { %v443_v3 = vperm.slane %v437_v58, 0  ;;  %v444_v4 = vperm.slane %v438_v59, 0  ;;  %v472_v9 = vmul.f32 %v468_v62, %v465_v61  ;;  %v482_v11 = vperm.slane %v476_v57, 2 }
 0x14e   : > { %v463_v7 = vperm.slane %v457_v63, 1  ;;  %v464_v8 = vperm.slane %v458_v0, 1  ;;  %v483_v15 = vperm.slane %v477_v60, 2  ;;  %v501_v26 = vperm.slane %v495_v14, 3 }
 0x14f   : > { %v451_v12 = vmul.f32 %v449_v1, %v443_v3  ;;  %v452_v13 = vmul.f32 %v449_v1, %v444_v4  ;;  %v475_v20 = vadd.f32 %v472_v9, %v453_v6  ;;  %v489_v17 = vmul.f32 %v487_v10, %v482_v11 }
 0x150   : > { %v470_v16 = vmul.f32 %v468_v62, %v463_v7  ;;  %v471_v18 = vmul.f32 %v468_v62, %v464_v8  ;;  %v490_v24 = vmul.f32 %v487_v10, %v483_v15  ;;  %v502_v27 = vperm.slane %v496_v19, 3 }
 0x151   : > { %v494_v30 = vadd.f32 %v491_v23, %v475_v20 }
 0x152   : > { %v473_v21 = vadd.f32 %v470_v16, %v451_v12  ;;  %v474_v22 = vadd.f32 %v471_v18, %v452_v13 }
 0x154   : > { %v492_v29 = vadd.f32 %v489_v17, %v473_v21  ;;  %v493_v34 = vadd.f32 %v490_v24, %v474_v22 }
 0x155   : > { %v506_v28 = vpop.permute.xlu1 %505 }
 0x156   : > { %v508_v31 = vmul.f32 %v506_v28, %v501_v26  ;;  %v509_v32 = vmul.f32 %v506_v28, %v502_v27  ;;  %v510_v33 = vmul.f32 %v506_v28, %v503_v25 }
 0x158   : > { %v511_v36 = vadd.f32 %v508_v31, %v492_v29  ;;  %v512_v37 = vadd.f32 %v509_v32, %v493_v34  ;;  %v513_v38 = vadd.f32 %v510_v33, %v494_v30 }
 0x15a   : > { %v519_v39 = vadd.f32 %v517_v35, %v511_v36  ;;  %v520_v40 = vadd.f32 %v517_v35, %v512_v37  ;;  %v521_v41 = vadd.f32 %v517_v35, %v513_v38 }
 0x15c   : > { %522 = vst [vmem:[%s215_s19] sm:$0xff] %v519_v39 }
 0x15d   : > { %523 = vst [vmem:[%s215_s19 + $0x8] sm:$0xff] %v520_v40 }
 0x15e   : > { %525 = vst.msk [vmem:[%s215_s19 + $0x10] sm:$0xff] %vm524_vm9, %v521_v41 }
 0x15f   : > { %760 = shalt.err (!%p757_p7)
}
 0x160   : > { %628 = dma.vmem_to_hbm [thread:$0]  (%p890_p11), %s541_s10, 384, %s543_s11, %s527_s12  }
 0x161 PF: > { %s554_s28 = sand.u32 1, %s787_s15   ;;  %p635_p8 = pnand %p615_p9, %p894_p12 }
 0x162   : > { %s555_s30 = scalar_lea.sflag [#allocation4], %s554_s28 }
 0x163   : > { %p636_p10 = pneg %p635_p8 }
 0x165   : > { %782 = dma.done.wait (%p636_p10), %s555_s30, 384  }
 0x166   : > { %784 = vsyncadd (%p636_p10), %s555_s30, 4294966912  ;;  %p17_p0 = scmp.ge.s32.totalorder %s869_s21, 4   ;;  %s1033_s15 = smov %s791_s16 }
 0x167   : > { %s1034_s16 = smov %s795_s17  ;;  %s1035_s17 = smov %s881_s24 }
 0x168   : > { %s1036_s18 = smov %s869_s21  ;;  %19 = sbr.rel (!%p17_p0) target bundleno = 5 (0x5), region = 81 }
 0x16d   :  { %561 = vsyncpa [#allocation3], 1 }
 0x16e   :  { %563 = vsyncpa [#allocation3 + $0x1], 1 }
 0x16f   :  { %564 = vsyncpa [#allocation4], 1 }
 0x170   :  { %566 = vsyncpa [#allocation4 + $0x1], 1 }

</bundles_post_ra>
